<compile_context>
chip_gen: v7x
topology: tpu7x:2x2x1
jax: 0.10.0
libtpu: 0.0.40
codegen_flags: <defaults>
</compile_context>

<pallas_src>
import jax
import jax.numpy as jnp
from jax import lax
from jax.experimental import pallas as pl
from jax.experimental.pallas import tpu as pltpu

_LANE = 128
_SUBLANE = 8


def _round_up(x, m):
    return (x + m - 1) // m * m


def _vmem_capacity_bytes():
    """Physical VMEM per TensorCore; conservative fallback = v7x's 64 MiB."""
    try:
        info = pltpu.get_tpu_info()
        cap = int(getattr(info, "vmem_capacity_bytes", 0))
        if cap > 0:
            return cap
    except Exception:
        pass
    return 64 * 1024 * 1024


def _fori(lo, hi, body, init, unroll):
    try:
        return lax.fori_loop(lo, hi, body, init, unroll=unroll)
    except TypeError:  # older jax without fori_loop(..., unroll=)
        return lax.fori_loop(lo, hi, body, init)


def _make_kernel(cin, cout, cc, tm_sub, cin_unroll):
    """Complex per-mode channel contraction.

    Block layouts (real/imag folded onto the sublane axis for w / o):
      x_ref: (2, Cin, TB, TM)      plane 0 = real, plane 1 = imag
      w_ref: (Cin, 2*Cout, TM)     rows [:Cout] real, rows [Cout:] imag
      o_ref: (TB, 2*Cout, TM)      same row split as w

      out[b, o, m] = sum_i x[b, i, m] * w[i, o, m]   (complex MAC)

    The contraction is tiled in-kernel over (128-aligned lane sub-tiles,
    Cout chunks) so the live vreg set of the inner Cin loop stays small no
    matter how large the DMA tile TM is; each chunk result is stored straight
    to o_ref (no VMEM scratch, no cross-grid-step accumulator).
    """

    def kernel(x_ref, w_ref, o_ref):
        tb = x_ref.shape[2]
        tm = x_ref.shape[3]

        for m0 in range(0, tm, tm_sub):        # static, 128-aligned lane tiles
            for c0 in range(0, cout, cc):      # static Cout chunks (<= 8 rows)
                nc = min(cc, cout - c0)

                def body(i, carry):
                    acc_re, acc_im = carry
                    # Dense (TB, tm_sub) slabs: Cin is a leading axis of the x
                    # block, so no sublane-strided extraction per step.
                    xr = x_ref[0, i, :, m0:m0 + tm_sub][:, None, :]
                    xi = x_ref[1, i, :, m0:m0 + tm_sub][:, None, :]
                    wr = w_ref[i, c0:c0 + nc, m0:m0 + tm_sub][None, :, :]
                    wi = w_ref[i, cout + c0:cout + c0 + nc,
                               m0:m0 + tm_sub][None, :, :]
                    # (a + ib)(c + id) = (ac - bd) + i(ad + bc)
                    acc_re = acc_re + (xr * wr - xi * wi)
                    acc_im = acc_im + (xr * wi + xi * wr)
                    return acc_re, acc_im

                zero = jnp.zeros((tb, nc, tm_sub), jnp.float32)
                acc_re, acc_im = _fori(0, cin, body, (zero, zero), cin_unroll)

                o_ref[:, c0:c0 + nc, m0:m0 + tm_sub] = acc_re
                o_ref[:, cout + c0:cout + c0 + nc, m0:m0 + tm_sub] = acc_im

    return kernel


def _pick_tiles(batch, cin, cout, m_total):
    """VMEM- and vreg-aware tile selection.

    Returns (tb, bp, tm, mp, cc, tm_sub, vmem_limit, deep_buffer).
    """
    cap = _vmem_capacity_bytes()
    mp128 = _round_up(m_total, _LANE)

    # Batch tile: batch sits on the sublane axis of the x block, so a partial
    # batch tile must be a multiple of 8; small batches are taken whole.
    if batch <= _SUBLANE:
        tb, bp = batch, batch
    else:
        tb = _SUBLANE
        bp = _round_up(batch, _SUBLANE)

    # In-kernel chunking (vreg working set): per-chunk accumulators are
    # (tb, cc, tm_sub) f32 for re and im.  Keep each around ~4K f32 (a few
    # vregs); cc fills the sublane axis whenever Cout allows.
    acc_budget = 4 * 1024
    cc = min(cout, _SUBLANE)
    tm_sub = max(_LANE, (acc_budget // max(1, tb * cc)) // _LANE * _LANE)

    sub = lambda n: _round_up(max(int(n), 1), _SUBLANE)

    def blocks_bytes(tm, bufs_xo=2):
        x_blk = 2 * cin * sub(tb) * tm * 4
        w_blk = cin * sub(2 * cout) * tm * 4      # resident across batch tiles
        o_blk = tb * sub(2 * cout) * tm * 4
        return bufs_xo * (x_blk + o_blk) + 2 * w_blk

    # DMA (BlockSpec) lane tile: largest multiple of 128 whose buffered block
    # set fits the per-generation VMEM budget.  Bigger tiles on 128 MiB parts
    # (v5e/v6e), tighter on v7x's 64 MiB.
    block_budget = int(0.55 * cap)
    n_sub_cap = 8 if cap > (96 << 20) else 4      # in-kernel lane sub-tiles
    tm_cap = min(mp128, n_sub_cap * tm_sub, 2048)
    cand = max(_LANE, (tm_cap // _LANE) * _LANE)
    while cand > _LANE:
        if blocks_bytes(cand) <= block_budget:
            break
        cand -= _LANE
    tm = max(_LANE, cand)
    mp = _round_up(m_total, tm)

    # v7x megacore: prefer >=2 cells along a parallel grid axis when it costs
    # no extra zero-padding.  A truly single-tile problem (the tiny demo
    # config: 128 modes, batch 2) legitimately stays grid (1, 1).
    if (mp // tm) * (bp // tb) < 2 and mp128 >= 2 * _LANE:
        cand = (mp128 // (2 * _LANE)) * _LANE
        while cand >= _LANE:
            if mp128 % cand == 0:
                tm, mp = cand, mp128
                break
            cand -= _LANE

    tm_sub = min(tm_sub, tm)

    # Deeper x/o buffering for bandwidth-limited parts (v5e): only when there
    # are enough grid steps to hide DMA behind and VMEM has room.
    grid_steps = (mp // tm) * (bp // tb)
    deep_buffer = (grid_steps >= 4 and hasattr(pl, "Buffered")
                   and blocks_bytes(tm, bufs_xo=3) <= int(0.65 * cap))

    # VMEM limit derived from the actual block sizes (not a flat constant),
    # with headroom for compiler scratch; never above 80% of physical VMEM.
    needed = blocks_bytes(tm, bufs_xo=3 if deep_buffer else 2)
    vmem_limit = max(32 << 20, min(int(0.8 * cap), needed + (16 << 20)))

    return tb, bp, tm, mp, cc, tm_sub, vmem_limit, deep_buffer


def _spectral_mul(x_planes, w_planes, *, cout, tb, tm, cc, tm_sub, cin_unroll,
                  vmem_limit, deep_buffer):
    """x: (2, Cin, Bp, Mp), w: (Cin, 2*Cout, Mp) -> (Bp, 2*Cout, Mp)."""
    _, cin, bp, mp = x_planes.shape
    # Batch is the innermost grid axis; the weight index_map ignores it so the
    # weight block stays resident in VMEM across batch tiles (no re-DMA).
    grid = (mp // tm, bp // tb)

    kernel = _make_kernel(cin, cout, cc, tm_sub, cin_unroll)
    out_shape = jax.ShapeDtypeStruct((bp, 2 * cout, mp), jnp.float32)
    params = pltpu.CompilerParams(
        dimension_semantics=("parallel", "parallel"),
        vmem_limit_bytes=int(vmem_limit),
    )

    def build(extra_bufs):
        kw = dict(pipeline_mode=pl.Buffered(3)) if extra_bufs else {}
        x_spec = pl.BlockSpec((2, cin, tb, tm), lambda m, b: (0, 0, b, m), **kw)
        w_spec = pl.BlockSpec((cin, 2 * cout, tm), lambda m, b: (0, 0, m))
        o_spec = pl.BlockSpec((tb, 2 * cout, tm), lambda m, b: (b, 0, m), **kw)
        return pl.pallas_call(
            kernel,
            out_shape=out_shape,
            grid=grid,
            in_specs=[x_spec, w_spec],
            out_specs=o_spec,
            compiler_params=params,
        )

    if deep_buffer:
        try:
            return build(True)(x_planes, w_planes)
        except Exception:
            pass  # older jax without BlockSpec(pipeline_mode=...): fall back
    return build(False)(x_planes, w_planes)


def spectral_conv2d_forward(x, w1_re, w1_im, w2_re, w2_im, modes1, modes2):
    """Forward pass matching the PyTorch SpectralConv2d semantics.

    x: (B, Cin, H, W) float32
    w*_re / w*_im: (Cin, Cout, modes1, modes2) float32
    returns: (B, Cout, H, W) float32
    """
    B, Cin, H, W = x.shape
    Cout = w1_re.shape[1]
    Wf = W // 2 + 1
    # Effective clamping identical to the PyTorch module (python slice
    # clamping limits the column count to the rfft width Wf).
    m1 = min(modes1, H)
    m2 = min(modes2, W, Wf)

    x_ft = jnp.fft.rfft2(x)                                   # (B,Cin,H,Wf) c64
    out_ft = jnp.zeros((B, Cout, H, Wf), dtype=jnp.complex64)

    if m1 == 0 or m2 == 0:
        return jnp.fft.irfft2(out_ft, s=(H, W)).astype(jnp.float32)

    mblk = m1 * m2
    m_total = 2 * mblk

    # Both frequency blocks concatenated along one flattened mode axis, so a
    # single lane-dense pallas_call handles weights1 (rows :m1) and weights2
    # (rows H-m1:) with >=128 lanes of real work.
    xb1 = x_ft[:, :, :m1, :m2].reshape(B, Cin, mblk)
    xb2 = x_ft[:, :, H - m1:, :m2].reshape(B, Cin, mblk)
    x_modes = jnp.concatenate([xb1, xb2], axis=-1)            # (B, Cin, M)

    w_re = jnp.concatenate(
        [w1_re[:, :, :m1, :m2].reshape(Cin, Cout, mblk),
         w2_re[:, :, :m1, :m2].reshape(Cin, Cout, mblk)], axis=-1)
    w_im = jnp.concatenate(
        [w1_im[:, :, :m1, :m2].reshape(Cin, Cout, mblk),
         w2_im[:, :, :m1, :m2].reshape(Cin, Cout, mblk)], axis=-1)

    tb, bp, tm, mp, cc, tm_sub, vmem_limit, deep_buffer = _pick_tiles(
        B, Cin, Cout, m_total)
    cin_unroll = True if Cin <= 16 else next(
        d for d in (8, 4, 2, 1) if Cin % d == 0)

    # x layout (2, Cin, B, M): channel leading so the per-Cin kernel read is a
    # dense (TB, TM) slab; real/imag as 2 planes (2 DMA streams, not 4).
    x_planes = jnp.stack(
        [jnp.real(x_modes), jnp.imag(x_modes)], axis=0).astype(jnp.float32)
    x_planes = jnp.swapaxes(x_planes, 1, 2)                   # (2, Cin, B, M)
    # w / o: real & imag folded onto the sublane axis (rows [:Cout] real,
    # rows [Cout:] imag) so small-Cout configs still fill (8,128) tiles.
    w_planes = jnp.concatenate([w_re, w_im], axis=1).astype(jnp.float32)

    pad_b, pad_m = bp - B, mp - m_total
    if pad_b or pad_m:
        x_planes = jnp.pad(x_planes, ((0, 0), (0, 0), (0, pad_b), (0, pad_m)))
    if pad_m:
        w_planes = jnp.pad(w_planes, ((0, 0), (0, 0), (0, pad_m)))

    o_planes = _spectral_mul(
        x_planes, w_planes, cout=Cout, tb=tb, tm=tm, cc=cc, tm_sub=tm_sub,
        cin_unroll=cin_unroll, vmem_limit=vmem_limit, deep_buffer=deep_buffer)

    o_re = o_planes[:B, :Cout, :m_total]
    o_im = o_planes[:B, Cout:2 * Cout, :m_total]
    o_complex = (o_re + 1j * o_im).astype(jnp.complex64)
    o1 = o_complex[..., :mblk].reshape(B, Cout, m1, m2)
    o2 = o_complex[..., mblk:].reshape(B, Cout, m1, m2)

    # Same write order as the PyTorch module: when H < 2*m1 the two blocks
    # overlap and block 2 overwrites block 1 (torch's in-place assignments).
    out_ft = out_ft.at[:, :, :m1, :m2].set(o1)
    out_ft = out_ft.at[:, :, H - m1:, :m2].set(o2)

    return jnp.fft.irfft2(out_ft, s=(H, W)).astype(jnp.float32)


def _reference_forward(x, w1_re, w1_im, w2_re, w2_im, modes1, modes2):
    """Pure-JAX reference (mirrors the torch code) for correctness checks."""
    B, Cin, H, W = x.shape
    Cout = w1_re.shape[1]
    Wf = W // 2 + 1
    m1 = min(modes1, H)
    m2 = min(modes2, W, Wf)   # same clamp as the Pallas path
    x_ft = jnp.fft.rfft2(x)
    w1 = (w1_re + 1j * w1_im).astype(jnp.complex64)
    w2 = (w2_re + 1j * w2_im).astype(jnp.complex64)
    out_ft = jnp.zeros((B, Cout, H, Wf), dtype=jnp.complex64)
    out_ft = out_ft.at[:, :, :m1, :m2].set(
        jnp.einsum('bixy,ioxy->boxy', x_ft[:, :, :m1, :m2], w1[:, :, :m1, :m2]))
    out_ft = out_ft.at[:, :, H - m1:, :m2].set(
        jnp.einsum('bixy,ioxy->boxy', x_ft[:, :, H - m1:, :m2], w2[:, :, :m1, :m2]))
    return jnp.fft.irfft2(out_ft, s=(H, W)).astype(jnp.float32)


if __name__ == "__main__":
    def _run_case(key, B, Cin, Cout, H, W, modes1, modes2):
        kx, k1r, k1i, k2r, k2i = jax.random.split(key, 5)
        scale = 1.0 / (Cin * Cout)
        w_shape = (Cin, Cout, modes1, modes2)
        # torch.rand(..., dtype=cfloat) draws real and imag parts from U[0, 1).
        w1_re = scale * jax.random.uniform(k1r, w_shape, dtype=jnp.float32)
        w1_im = scale * jax.random.uniform(k1i, w_shape, dtype=jnp.float32)
        w2_re = scale * jax.random.uniform(k2r, w_shape, dtype=jnp.float32)
        w2_im = scale * jax.random.uniform(k2i, w_shape, dtype=jnp.float32)
        x = jax.random.normal(kx, (B, Cin, H, W), dtype=jnp.float32)

        out = spectral_conv2d_forward(x, w1_re, w1_im, w2_re, w2_im,
                                      modes1, modes2)
        out = jax.block_until_ready(out)
        ref = jax.block_until_ready(
            _reference_forward(x, w1_re, w1_im, w2_re, w2_im, modes1, modes2))
        assert out.shape == (B, Cout, H, W), out.shape
        err = float(jnp.max(jnp.abs(out - ref)))
        assert jnp.allclose(out, ref, atol=1e-4, rtol=1e-4), err

    key = jax.random.PRNGKey(0)
    k0, k1 = jax.random.split(key)
    # Main small config consistent with the module's forward.
    _run_case(k0, B=2, Cin=4, Cout=4, H=16, W=16, modes1=8, modes2=8)
    # Overlap case: H < 2*modes1, so block 2 overwrites block 1 exactly like
    # torch's sequential in-place writes (review correctness concern).
    _run_case(k1, B=2, Cin=4, Cout=4, H=8, W=16, modes1=8, modes2=4)

    print("KERNEL_OK")
</pallas_src>

<mosaic_0001>
module attributes {stable_mosaic.version = 11 : i64} {
  func.func @kernel(%arg0: i32, %arg1: i32, %arg2: memref<2x4x2x128xf32, #tpu.memory_space<vmem>>, %arg3: memref<4x8x128xf32, #tpu.memory_space<vmem>>, %arg4: memref<2x8x128xf32, #tpu.memory_space<vmem>>) attributes {dimension_semantics = [#tpu.dimension_semantics<parallel>, #tpu.dimension_semantics<parallel>], iteration_bounds = array<i64: 1, 1>, scalar_prefetch = 0 : i64, scratch_operands = 0 : i64, tpu.core_type = #tpu.core_type<tc>, window_params = [{transform_indices = @transform_0, window_bounds = array<i64: 2, 4, 2, 128>}, {transform_indices = @transform_1, window_bounds = array<i64: 4, 8, 128>}, {transform_indices = @transform_2, window_bounds = array<i64: 2, 8, 128>}]} {
    %cst = arith.constant 0.000000e+00 : f32
    %0 = vector.broadcast %cst : f32 to vector<2x4x128xf32>
    %c0_i32 = arith.constant 0 : i32
    %c0 = arith.constant 0 : index
    %1 = arith.index_cast %c0_i32 : i32 to index
    %c0_0 = arith.constant 0 : index
    %c0_1 = arith.constant 0 : index
    %2 = vector.load %arg2[%c0, %1, %c0_0, %c0_1] : memref<2x4x2x128xf32, #tpu.memory_space<vmem>>, vector<1x1x2x128xf32>
    %3 = vector.shape_cast %2 : vector<1x1x2x128xf32> to vector<2x128xf32>
    %4 = vector.shape_cast %3 : vector<2x128xf32> to vector<2x1x128xf32>
    %c1 = arith.constant 1 : index
    %5 = arith.index_cast %c0_i32 : i32 to index
    %c0_2 = arith.constant 0 : index
    %c0_3 = arith.constant 0 : index
    %6 = vector.load %arg2[%c1, %5, %c0_2, %c0_3] : memref<2x4x2x128xf32, #tpu.memory_space<vmem>>, vector<1x1x2x128xf32>
    %7 = vector.shape_cast %6 : vector<1x1x2x128xf32> to vector<2x128xf32>
    %8 = vector.shape_cast %7 : vector<2x128xf32> to vector<2x1x128xf32>
    %9 = arith.index_cast %c0_i32 : i32 to index
    %c0_4 = arith.constant 0 : index
    %c0_5 = arith.constant 0 : index
    %10 = vector.load %arg3[%9, %c0_4, %c0_5] : memref<4x8x128xf32, #tpu.memory_space<vmem>>, vector<1x4x128xf32>
    %11 = vector.shape_cast %10 : vector<1x4x128xf32> to vector<4x128xf32>
    %12 = vector.shape_cast %11 : vector<4x128xf32> to vector<1x4x128xf32>
    %13 = arith.index_cast %c0_i32 : i32 to index
    %c4 = arith.constant 4 : index
    %c0_6 = arith.constant 0 : index
    %14 = vector.load %arg3[%13, %c4, %c0_6] : memref<4x8x128xf32, #tpu.memory_space<vmem>>, vector<1x4x128xf32>
    %15 = vector.shape_cast %14 : vector<1x4x128xf32> to vector<4x128xf32>
    %16 = vector.shape_cast %15 : vector<4x128xf32> to vector<1x4x128xf32>
    %17 = vector.broadcast %4 : vector<2x1x128xf32> to vector<2x4x128xf32>
    %18 = vector.broadcast %12 : vector<1x4x128xf32> to vector<2x4x128xf32>
    %19 = arith.mulf %17, %18 : vector<2x4x128xf32>
    %20 = vector.broadcast %8 : vector<2x1x128xf32> to vector<2x4x128xf32>
    %21 = vector.broadcast %16 : vector<1x4x128xf32> to vector<2x4x128xf32>
    %22 = arith.mulf %20, %21 : vector<2x4x128xf32>
    %23 = arith.subf %19, %22 : vector<2x4x128xf32>
    %24 = arith.addf %0, %23 : vector<2x4x128xf32>
    %25 = vector.broadcast %4 : vector<2x1x128xf32> to vector<2x4x128xf32>
    %26 = vector.broadcast %16 : vector<1x4x128xf32> to vector<2x4x128xf32>
    %27 = arith.mulf %25, %26 : vector<2x4x128xf32>
    %28 = vector.broadcast %8 : vector<2x1x128xf32> to vector<2x4x128xf32>
    %29 = vector.broadcast %12 : vector<1x4x128xf32> to vector<2x4x128xf32>
    %30 = arith.mulf %28, %29 : vector<2x4x128xf32>
    %31 = arith.addf %27, %30 : vector<2x4x128xf32>
    %32 = arith.addf %0, %31 : vector<2x4x128xf32>
    %c1_i32 = arith.constant 1 : i32
    %c0_7 = arith.constant 0 : index
    %33 = arith.index_cast %c1_i32 : i32 to index
    %c0_8 = arith.constant 0 : index
    %c0_9 = arith.constant 0 : index
    %34 = vector.load %arg2[%c0_7, %33, %c0_8, %c0_9] : memref<2x4x2x128xf32, #tpu.memory_space<vmem>>, vector<1x1x2x128xf32>
    %35 = vector.shape_cast %34 : vector<1x1x2x128xf32> to vector<2x128xf32>
    %36 = vector.shape_cast %35 : vector<2x128xf32> to vector<2x1x128xf32>
    %c1_10 = arith.constant 1 : index
    %37 = arith.index_cast %c1_i32 : i32 to index
    %c0_11 = arith.constant 0 : index
    %c0_12 = arith.constant 0 : index
    %38 = vector.load %arg2[%c1_10, %37, %c0_11, %c0_12] : memref<2x4x2x128xf32, #tpu.memory_space<vmem>>, vector<1x1x2x128xf32>
    %39 = vector.shape_cast %38 : vector<1x1x2x128xf32> to vector<2x128xf32>
    %40 = vector.shape_cast %39 : vector<2x128xf32> to vector<2x1x128xf32>
    %41 = arith.index_cast %c1_i32 : i32 to index
    %c0_13 = arith.constant 0 : index
    %c0_14 = arith.constant 0 : index
    %42 = vector.load %arg3[%41, %c0_13, %c0_14] : memref<4x8x128xf32, #tpu.memory_space<vmem>>, vector<1x4x128xf32>
    %43 = vector.shape_cast %42 : vector<1x4x128xf32> to vector<4x128xf32>
    %44 = vector.shape_cast %43 : vector<4x128xf32> to vector<1x4x128xf32>
    %45 = arith.index_cast %c1_i32 : i32 to index
    %c4_15 = arith.constant 4 : index
    %c0_16 = arith.constant 0 : index
    %46 = vector.load %arg3[%45, %c4_15, %c0_16] : memref<4x8x128xf32, #tpu.memory_space<vmem>>, vector<1x4x128xf32>
    %47 = vector.shape_cast %46 : vector<1x4x128xf32> to vector<4x128xf32>
    %48 = vector.shape_cast %47 : vector<4x128xf32> to vector<1x4x128xf32>
    %49 = vector.broadcast %36 : vector<2x1x128xf32> to vector<2x4x128xf32>
    %50 = vector.broadcast %44 : vector<1x4x128xf32> to vector<2x4x128xf32>
    %51 = arith.mulf %49, %50 : vector<2x4x128xf32>
    %52 = vector.broadcast %40 : vector<2x1x128xf32> to vector<2x4x128xf32>
    %53 = vector.broadcast %48 : vector<1x4x128xf32> to vector<2x4x128xf32>
    %54 = arith.mulf %52, %53 : vector<2x4x128xf32>
    %55 = arith.subf %51, %54 : vector<2x4x128xf32>
    %56 = arith.addf %24, %55 : vector<2x4x128xf32>
    %57 = vector.broadcast %36 : vector<2x1x128xf32> to vector<2x4x128xf32>
    %58 = vector.broadcast %48 : vector<1x4x128xf32> to vector<2x4x128xf32>
    %59 = arith.mulf %57, %58 : vector<2x4x128xf32>
    %60 = vector.broadcast %40 : vector<2x1x128xf32> to vector<2x4x128xf32>
    %61 = vector.broadcast %44 : vector<1x4x128xf32> to vector<2x4x128xf32>
    %62 = arith.mulf %60, %61 : vector<2x4x128xf32>
    %63 = arith.addf %59, %62 : vector<2x4x128xf32>
    %64 = arith.addf %32, %63 : vector<2x4x128xf32>
    %c2_i32 = arith.constant 2 : i32
    %c0_17 = arith.constant 0 : index
    %65 = arith.index_cast %c2_i32 : i32 to index
    %c0_18 = arith.constant 0 : index
    %c0_19 = arith.constant 0 : index
    %66 = vector.load %arg2[%c0_17, %65, %c0_18, %c0_19] : memref<2x4x2x128xf32, #tpu.memory_space<vmem>>, vector<1x1x2x128xf32>
    %67 = vector.shape_cast %66 : vector<1x1x2x128xf32> to vector<2x128xf32>
    %68 = vector.shape_cast %67 : vector<2x128xf32> to vector<2x1x128xf32>
    %c1_20 = arith.constant 1 : index
    %69 = arith.index_cast %c2_i32 : i32 to index
    %c0_21 = arith.constant 0 : index
    %c0_22 = arith.constant 0 : index
    %70 = vector.load %arg2[%c1_20, %69, %c0_21, %c0_22] : memref<2x4x2x128xf32, #tpu.memory_space<vmem>>, vector<1x1x2x128xf32>
    %71 = vector.shape_cast %70 : vector<1x1x2x128xf32> to vector<2x128xf32>
    %72 = vector.shape_cast %71 : vector<2x128xf32> to vector<2x1x128xf32>
    %73 = arith.index_cast %c2_i32 : i32 to index
    %c0_23 = arith.constant 0 : index
    %c0_24 = arith.constant 0 : index
    %74 = vector.load %arg3[%73, %c0_23, %c0_24] : memref<4x8x128xf32, #tpu.memory_space<vmem>>, vector<1x4x128xf32>
    %75 = vector.shape_cast %74 : vector<1x4x128xf32> to vector<4x128xf32>
    %76 = vector.shape_cast %75 : vector<4x128xf32> to vector<1x4x128xf32>
    %77 = arith.index_cast %c2_i32 : i32 to index
    %c4_25 = arith.constant 4 : index
    %c0_26 = arith.constant 0 : index
    %78 = vector.load %arg3[%77, %c4_25, %c0_26] : memref<4x8x128xf32, #tpu.memory_space<vmem>>, vector<1x4x128xf32>
    %79 = vector.shape_cast %78 : vector<1x4x128xf32> to vector<4x128xf32>
    %80 = vector.shape_cast %79 : vector<4x128xf32> to vector<1x4x128xf32>
    %81 = vector.broadcast %68 : vector<2x1x128xf32> to vector<2x4x128xf32>
    %82 = vector.broadcast %76 : vector<1x4x128xf32> to vector<2x4x128xf32>
    %83 = arith.mulf %81, %82 : vector<2x4x128xf32>
    %84 = vector.broadcast %72 : vector<2x1x128xf32> to vector<2x4x128xf32>
    %85 = vector.broadcast %80 : vector<1x4x128xf32> to vector<2x4x128xf32>
    %86 = arith.mulf %84, %85 : vector<2x4x128xf32>
    %87 = arith.subf %83, %86 : vector<2x4x128xf32>
    %88 = arith.addf %56, %87 : vector<2x4x128xf32>
    %89 = vector.broadcast %68 : vector<2x1x128xf32> to vector<2x4x128xf32>
    %90 = vector.broadcast %80 : vector<1x4x128xf32> to vector<2x4x128xf32>
    %91 = arith.mulf %89, %90 : vector<2x4x128xf32>
    %92 = vector.broadcast %72 : vector<2x1x128xf32> to vector<2x4x128xf32>
    %93 = vector.broadcast %76 : vector<1x4x128xf32> to vector<2x4x128xf32>
    %94 = arith.mulf %92, %93 : vector<2x4x128xf32>
    %95 = arith.addf %91, %94 : vector<2x4x128xf32>
    %96 = arith.addf %64, %95 : vector<2x4x128xf32>
    %c3_i32 = arith.constant 3 : i32
    %c0_27 = arith.constant 0 : index
    %97 = arith.index_cast %c3_i32 : i32 to index
    %c0_28 = arith.constant 0 : index
    %c0_29 = arith.constant 0 : index
    %98 = vector.load %arg2[%c0_27, %97, %c0_28, %c0_29] : memref<2x4x2x128xf32, #tpu.memory_space<vmem>>, vector<1x1x2x128xf32>
    %99 = vector.shape_cast %98 : vector<1x1x2x128xf32> to vector<2x128xf32>
    %100 = vector.shape_cast %99 : vector<2x128xf32> to vector<2x1x128xf32>
    %c1_30 = arith.constant 1 : index
    %101 = arith.index_cast %c3_i32 : i32 to index
    %c0_31 = arith.constant 0 : index
    %c0_32 = arith.constant 0 : index
    %102 = vector.load %arg2[%c1_30, %101, %c0_31, %c0_32] : memref<2x4x2x128xf32, #tpu.memory_space<vmem>>, vector<1x1x2x128xf32>
    %103 = vector.shape_cast %102 : vector<1x1x2x128xf32> to vector<2x128xf32>
    %104 = vector.shape_cast %103 : vector<2x128xf32> to vector<2x1x128xf32>
    %105 = arith.index_cast %c3_i32 : i32 to index
    %c0_33 = arith.constant 0 : index
    %c0_34 = arith.constant 0 : index
    %106 = vector.load %arg3[%105, %c0_33, %c0_34] : memref<4x8x128xf32, #tpu.memory_space<vmem>>, vector<1x4x128xf32>
    %107 = vector.shape_cast %106 : vector<1x4x128xf32> to vector<4x128xf32>
    %108 = vector.shape_cast %107 : vector<4x128xf32> to vector<1x4x128xf32>
    %109 = arith.index_cast %c3_i32 : i32 to index
    %c4_35 = arith.constant 4 : index
    %c0_36 = arith.constant 0 : index
    %110 = vector.load %arg3[%109, %c4_35, %c0_36] : memref<4x8x128xf32, #tpu.memory_space<vmem>>, vector<1x4x128xf32>
    %111 = vector.shape_cast %110 : vector<1x4x128xf32> to vector<4x128xf32>
    %112 = vector.shape_cast %111 : vector<4x128xf32> to vector<1x4x128xf32>
    %113 = vector.broadcast %100 : vector<2x1x128xf32> to vector<2x4x128xf32>
    %114 = vector.broadcast %108 : vector<1x4x128xf32> to vector<2x4x128xf32>
    %115 = arith.mulf %113, %114 : vector<2x4x128xf32>
    %116 = vector.broadcast %104 : vector<2x1x128xf32> to vector<2x4x128xf32>
    %117 = vector.broadcast %112 : vector<1x4x128xf32> to vector<2x4x128xf32>
    %118 = arith.mulf %116, %117 : vector<2x4x128xf32>
    %119 = arith.subf %115, %118 : vector<2x4x128xf32>
    %120 = arith.addf %88, %119 : vector<2x4x128xf32>
    %121 = vector.broadcast %100 : vector<2x1x128xf32> to vector<2x4x128xf32>
    %122 = vector.broadcast %112 : vector<1x4x128xf32> to vector<2x4x128xf32>
    %123 = arith.mulf %121, %122 : vector<2x4x128xf32>
    %124 = vector.broadcast %104 : vector<2x1x128xf32> to vector<2x4x128xf32>
    %125 = vector.broadcast %108 : vector<1x4x128xf32> to vector<2x4x128xf32>
    %126 = arith.mulf %124, %125 : vector<2x4x128xf32>
    %127 = arith.addf %123, %126 : vector<2x4x128xf32>
    %128 = arith.addf %96, %127 : vector<2x4x128xf32>
    %c4_i32 = arith.constant 4 : i32
    %c0_37 = arith.constant 0 : index
    %c0_38 = arith.constant 0 : index
    %c0_39 = arith.constant 0 : index
    %129 = vector.load %arg4[%c0_37, %c0_38, %c0_39] : memref<2x8x128xf32, #tpu.memory_space<vmem>>, vector<2x4x128xf32>
    tpu.vector_store %arg4[%c0_37, %c0_38, %c0_39], %120 {strides = array<i32>} : memref<2x8x128xf32, #tpu.memory_space<vmem>>, vector<2x4x128xf32>,
    %c0_40 = arith.constant 0 : index
    %c4_41 = arith.constant 4 : index
    %c0_42 = arith.constant 0 : index
    %130 = vector.load %arg4[%c0_40, %c4_41, %c0_42] : memref<2x8x128xf32, #tpu.memory_space<vmem>>, vector<2x4x128xf32>
    tpu.vector_store %arg4[%c0_40, %c4_41, %c0_42], %128 {strides = array<i32>} : memref<2x8x128xf32, #tpu.memory_space<vmem>>, vector<2x4x128xf32>,
    return
  }
  func.func @transform_0(%arg0: i32, %arg1: i32) -> (i32, i32, i32, i32) {
    %c0_i32 = arith.constant 0 : i32
    %c0_i32_0 = arith.constant 0 : i32
    %c0_i32_1 = arith.constant 0 : i32
    return %c0_i32, %c0_i32_0, %arg1, %arg0 : i32, i32, i32, i32
  }
  func.func @transform_1(%arg0: i32, %arg1: i32) -> (i32, i32, i32) {
    %c0_i32 = arith.constant 0 : i32
    %c0_i32_0 = arith.constant 0 : i32
    %c0_i32_1 = arith.constant 0 : i32
    return %c0_i32, %c0_i32_0, %arg0 : i32, i32, i32
  }
  func.func @transform_2(%arg0: i32, %arg1: i32) -> (i32, i32, i32) {
    %c0_i32 = arith.constant 0 : i32
    %c0_i32_0 = arith.constant 0 : i32
    return %arg1, %c0_i32, %arg0 : i32, i32, i32
  }
}

</mosaic_0001>

<bundles_post_ra>
// kernel: tpu_custom_call.1
= control target key start
LH: loop header
LB: loop body
LE: loop exit
PB: predicated region body
PF: predicated region fallthrough
CT: control target
= control target key end

     0   :  { %7 = vsyncpa [#allocation3], 0  ;;  %s661_s0 = inlined_call_operand.hbm [shape: f32[2,4,2,128], index: 0, kind: input, shape index: {}]   ;;  %s662_s1 = inlined_call_operand.hbm [shape: f32[4,8,128], index: 1, kind: input, shape index: {}]   ;;  %s663_s2 = inlined_call_operand.hbm [shape: f32[2,8,128], index: 2, kind: output, shape index: {}]  }
   0x1   :  { %8 = vsyncpa [#allocation6], 0 }
   0x2   :  { %9 = vsyncpa [#allocation4], 0  ;;  %s504_s9 = smov [#allocation2]   ;;  %s432_s13 = scalar_lea.hbm %s661_s0, 256 }
   0x3   :  { %s15_s10 = sshll.u32 %s504_s9, 4  ;;  %p433_p0 = scmp.ne.s32.totalorder %s661_s0, %s432_s13  ;;  %s16_s10 = int_to_ptr.vmem [resolvable:$true] %s15_s10 }
   0x4   :  { %p436_p1 = scmp.lt.u32.totalorder %s432_s13, %s661_s0 }
   0x6   :  { %p438_p2 = pnand %p436_p1, %p433_p0 }
   0x8   :  { %441 = shalt.err (!%p438_p2)
}
   0x9   :  { %s442_s18 = scalar_lea.vmem %s16_s10, 256  ;;  %p447_p4 = scmp.lt.s32.totalorder %s16_s10, %s16_s10 }
   0xa   :  { %p443_p3 = scmp.ne.s32.totalorder %s16_s10, %s442_s18  ;;  %p448_p5 = scmp.lt.s32.totalorder %s442_s18, %s442_s18 }
   0xc   :  { %p449_p6 = por %p448_p5, %p447_p4 }
   0xe   :  { %p450_p7 = pnand %p449_p6, %p443_p3 }
  0x10   :  { %453 = shalt.err (!%p450_p7)
}
  0x11   :  { %s505_s19 = smov 32   ;;  %s506_s20 = smov 2  }
  0x12   :  { %21 = dma.hbm_to_vmem [thread:$0]  %s661_s0, 256, %s16_s10, [#allocation3], %s505_s19, %s505_s19, %s506_s20  }
  0x13   :  { %s507_s23 = smov [#allocation5]   ;;  %s454_s27 = scalar_lea.hbm %s662_s1, 512 }
  0x14   :  { %s27_s24 = sshll.u32 %s507_s23, 4  ;;  %p455_p8 = scmp.ne.s32.totalorder %s662_s1, %s454_s27  ;;  %s28_s24 = int_to_ptr.vmem [resolvable:$true] %s27_s24 }
  0x15   :  { %p458_p9 = scmp.lt.u32.totalorder %s454_s27, %s662_s1 }
  0x17   :  { %p460_p10 = pnand %p458_p9, %p455_p8 }
  0x19   :  { %463 = shalt.err (!%p460_p10)
}
  0x1a   :  { %s464_s4 = scalar_lea.vmem %s28_s24, 512  ;;  %p469_p12 = scmp.lt.s32.totalorder %s28_s24, %s28_s24 }
  0x1b   :  { %p465_p11 = scmp.ne.s32.totalorder %s28_s24, %s464_s4  ;;  %p470_p13 = scmp.lt.s32.totalorder %s464_s4, %s464_s4 }
  0x1d   :  { %p471_p0 = por %p470_p13, %p469_p12 }
  0x1f   :  { %p472_p1 = pnand %p471_p0, %p465_p11 }
  0x21   :  { %475 = shalt.err (!%p472_p1)
}
  0x22   :  { %s508_s0 = smov 128   ;;  %s509_s5 = smov 8  }
  0x23   :  { %33 = dma.hbm_to_vmem [thread:$0]  %s662_s1, 512, %s28_s24, [#allocation6], %s508_s0, %s508_s0, %s509_s5  }
  0x24   :  { %498 = dma.done.wait [#allocation3], 256  }
  0x25   :  { %499 = vsyncadd [#allocation3], 4294967040 }
  0x26   :  { %500 = dma.done.wait [#allocation6], 512  }
  0x27   :  { %501 = vsyncadd [#allocation6], 4294966784  ;;  %v53_v0 = vlaneseq  ;;  %v510_v1 = vmov 1966171168   ;;  %v560_v12 = vld [vmem:[#allocation5] sm:$0xf] }
  0x28   :  { %v51_v2 = vunpack.c.l.s4 %v510_v1  ;;  %v416_v7 = vld.sshfl [vmem:[#allocation2] sm:$0x11 pattern:$0x75316420]  ;;  %v562_v15 = vld [vmem:[#allocation5 + $0x4] sm:$0xf] }
  0x29   :  { %v54_v3 = vshrl.u32 %v53_v0, 7  ;;  %v417_v9 = vld.sshfl [vmem:[#allocation2 + $0x8] sm:$0x11 pattern:$0x75316420]  ;;  %v49_v10 = vcombine.high %v416_v7, %v416_v7  ;;  %s511_s1 = smov [#allocation7]  }
  0x2a   :  { %v52_v4 = vunpack.c.0.s8 %v51_v2  ;;  %v418_v13 = vld.sshfl [vmem:[#allocation2 + $0x2] sm:$0x11 pattern:$0x75316420]  ;;  %v74_v14 = vcombine.high %v417_v9, %v417_v9  ;;  %v569_v23 = vld [vmem:[#allocation5 + $0x8] sm:$0xf] }
  0x2b   :  { %v556_v6 = vsub.s32 0, %v54_v3  ;;  %v419_v18 = vld.sshfl [vmem:[#allocation2 + $0xa] sm:$0x11 pattern:$0x75316420]  ;;  %v137_v20 = vcombine.high %v418_v13, %v418_v13  ;;  %s403_s8 = sshll.u32 %s511_s1, 4  ;;  %s404_s8 = int_to_ptr.vmem [resolvable:$true] %s403_s8 }
  0x2c   :  { %v554_v5 = vsub.s32 %v52_v4, %v54_v3  ;;  %v420_v24 = vld.sshfl [vmem:[#allocation2 + $0x4] sm:$0x11 pattern:$0x75316420]  ;;  %v162_v26 = vcombine.high %v419_v18, %v419_v18  ;;  %v573_v28 = vld [vmem:[#allocation5 + $0xc] sm:$0xf]  ;;  %p481_p3 = scmp.lt.s32.totalorder %s404_s8, %s404_s8 }
  0x2d   :  { %v421_v31 = vld.sshfl [vmem:[#allocation2 + $0xc] sm:$0x11 pattern:$0x75316420]  ;;  %v583_v36 = vld [vmem:[#allocation5 + $0x10] sm:$0xf]  ;;  %v226_v62 = vcombine.high %v420_v24, %v420_v24 }
  0x2e   :  { %v56_v8 = vrot.slane %v416_v7, %v554_v5  ;;  %v81_v11 = vrot.slane %v417_v9, %v554_v5  ;;  %v144_v17 = vrot.slane %v418_v13, %v554_v5  ;;  %v63_v19 = vrot.slane %v49_v10, %v554_v5  ;;  %v422_v37 = vld.sshfl [vmem:[#allocation2 + $0x6] sm:$0x11 pattern:$0x75316420]  ;;  %v598_v49 = vld [vmem:[#allocation5 + $0x18] sm:$0xf] }
  0x2f   :  { %v169_v22 = vrot.slane %v419_v18, %v554_v5  ;;  %v88_v25 = vrot.slane %v74_v14, %v554_v5  ;;  %v233_v30 = vrot.slane %v420_v24, %v554_v5  ;;  %v258_v35 = vrot.slane %v421_v31, %v554_v5  ;;  %v589_v40 = vld [vmem:[#allocation5 + $0x14] sm:$0xf]  ;;  %v423_v43 = vld.sshfl [vmem:[#allocation2 + $0xe] sm:$0x11 pattern:$0x75316420] }
  0x30   :  { %v94_v16 = vrot.slane %v56_v8, %v556_v6  ;;  %v106_v21 = vrot.slane %v81_v11, %v556_v6  ;;  %v183_v29 = vrot.slane %v144_v17, %v556_v6  ;;  %v578_v32 = vrot.slane %v63_v19, %v556_v6  ;;  %v601_v51 = vld [vmem:[#allocation5 + $0x1c] sm:$0xf]  ;;  %s476_s9 = scalar_lea.vmem %s404_s8, 256 }
  0x31   :  { %v195_v34 = vrot.slane %v169_v22, %v556_v6  ;;  %v586_v38 = vrot.slane %v88_v25, %v556_v6  ;;  %v272_v41 = vrot.slane %v233_v30, %v556_v6  ;;  %v322_v42 = vrot.slane %v422_v37, %v554_v5  ;;  %p477_p2 = scmp.ne.s32.totalorder %s404_s8, %s476_s9  ;;  %p482_p4 = scmp.lt.s32.totalorder %s476_s9, %s476_s9 }
  0x32   :  { %v101_v27 = vmul.f32 %v94_v16, %v560_v12  ;;  %v113_v33 = vmul.f32 %v106_v21, %v562_v15  ;;  %v190_v39 = vmul.f32 %v183_v29, %v569_v23  ;;  %v102_v44 = vmul.f32 %v578_v32, %v560_v12 }
  0x33   :  { %v202_v46 = vmul.f32 %v195_v34, %v573_v28  ;;  %v284_v47 = vrot.slane %v258_v35, %v556_v6  ;;  %v347_v48 = vrot.slane %v423_v43, %v554_v5  ;;  %v279_v50 = vmul.f32 %v272_v41, %v583_v36  ;;  %p483_p5 = por %p482_p4, %p481_p3 }
  0x34   :  { %v115_v45 = vsub.f32 %v101_v27, %v113_v33  ;;  %v361_v52 = vrot.slane %v322_v42, %v556_v6  ;;  %v114_v53 = vmul.f32 %v586_v38, %v562_v15  ;;  %v151_v54 = vrot.slane %v137_v20, %v554_v5 }
  0x35   :  { %v204_v55 = vsub.f32 %v190_v39, %v202_v46  ;;  %v291_v56 = vmul.f32 %v284_v47, %v589_v40  ;;  %v373_v57 = vrot.slane %v347_v48, %v556_v6  ;;  %v176_v58 = vrot.slane %v162_v26, %v554_v5  ;;  %p484_p6 = pnand %p483_p5, %p477_p2 }
  0x36   :  { %v368_v59 = vmul.f32 %v361_v52, %v598_v49  ;;  %v116_v60 = vsub.f32 %v102_v44, %v114_v53  ;;  %v187_v61 = vrot.slane %v151_v54, %v556_v6  ;;  %v240_v4 = vrot.slane %v226_v62, %v554_v5 }
  0x37   :  { %v206_v63 = vadd.f32 %v204_v55, %v115_v45  ;;  %v293_v0 = vsub.f32 %v279_v50, %v291_v56  ;;  %v380_v1 = vmul.f32 %v373_v57, %v601_v51  ;;  %v199_v2 = vrot.slane %v176_v58, %v556_v6 }
  0x38   :  { %v191_v3 = vmul.f32 %v187_v61, %v569_v23  ;;  %v251_v7 = vcombine.high %v421_v31, %v421_v31  ;;  %v315_v8 = vcombine.high %v422_v37, %v422_v37  ;;  %v340_v13 = vcombine.high %v423_v43, %v423_v43 }
  0x39   :  { %v295_v9 = vadd.f32 %v293_v0, %v206_v63  ;;  %v382_v10 = vsub.f32 %v368_v59, %v380_v1  ;;  %v203_v11 = vmul.f32 %v199_v2, %v573_v28  ;;  %v276_v17 = vrot.slane %v240_v4, %v556_v6 }
  0x3a   :  { %v265_v14 = vrot.slane %v251_v7, %v554_v5  ;;  %v329_v18 = vrot.slane %v315_v8, %v554_v5  ;;  %v119_v19 = vmul.f32 %v94_v16, %v562_v15  ;;  %v354_v24 = vrot.slane %v340_v13, %v554_v5 }
  0x3b   :  { %v384_v20 = vadd.f32 %v382_v10, %v295_v9  ;;  %v205_v22 = vsub.f32 %v191_v3, %v203_v11  ;;  %v121_v25 = vmul.f32 %v106_v21, %v560_v12  ;;  %v280_v26 = vmul.f32 %v276_v17, %v583_v36 }
  0x3c   :  { %v288_v27 = vrot.slane %v265_v14, %v556_v6  ;;  %v365_v30 = vrot.slane %v329_v18, %v556_v6  ;;  %v208_v31 = vmul.f32 %v183_v29, %v573_v28  ;;  %v377_v35 = vrot.slane %v354_v24, %v556_v6 }
  0x3d   :  { %394 = vst [vmem:[#allocation7] sm:$0xf] %v384_v20  ;;  %v207_v33 = vadd.f32 %v205_v22, %v116_v60  ;;  %v123_v37 = vadd.f32 %v121_v25, %v119_v19  ;;  %v210_v16 = vmul.f32 %v195_v34, %v569_v23  ;;  %v297_v21 = vmul.f32 %v272_v41, %v589_v40 }
  0x3e   :  { %v292_v39 = vmul.f32 %v288_v27, %v589_v40  ;;  %v369_v5 = vmul.f32 %v365_v30, %v598_v49  ;;  %v299_v42 = vmul.f32 %v284_v47, %v583_v36  ;;  %v381_v43 = vmul.f32 %v377_v35, %v601_v51 }
  0x3f   :  { %v212_v44 = vadd.f32 %v210_v16, %v208_v31  ;;  %v386_v29 = vmul.f32 %v361_v52, %v601_v51  ;;  %v388_v45 = vmul.f32 %v373_v57, %v598_v49  ;;  %v120_v34 = vmul.f32 %v578_v32, %v562_v15 }
  0x40   :  { %v294_v46 = vsub.f32 %v280_v26, %v292_v39  ;;  %v301_v6 = vadd.f32 %v299_v42, %v297_v21  ;;  %v122_v48 = vmul.f32 %v586_v38, %v560_v12  ;;  %v383_v50 = vsub.f32 %v369_v5, %v381_v43 }
  0x41   :  { %v214_v53 = vadd.f32 %v212_v44, %v123_v37  ;;  %v390_v41 = vadd.f32 %v388_v45, %v386_v29  ;;  %v209_v47 = vmul.f32 %v187_v61, %v573_v28  ;;  %v211_v56 = vmul.f32 %v199_v2, %v569_v23 }
  0x42   :  { %v296_v54 = vadd.f32 %v294_v46, %v207_v33  ;;  %v124_v55 = vadd.f32 %v122_v48, %v120_v34  ;;  %v298_v52 = vmul.f32 %v276_v17, %v589_v40  ;;  %v300_v58 = vmul.f32 %v288_v27, %v583_v36 }
  0x43   :  { %v303_v57 = vadd.f32 %v301_v6, %v214_v53  ;;  %v387_v59 = vmul.f32 %v365_v30, %v601_v51  ;;  %v389_v15 = vmul.f32 %v377_v35, %v598_v49  ;;  %v213_v12 = vadd.f32 %v211_v56, %v209_v47 }
  0x44   :  { %v385_v32 = vadd.f32 %v383_v50, %v296_v54  ;;  %v302_v60 = vadd.f32 %v300_v58, %v298_v52 }
  0x45   :  { %v392_v38 = vadd.f32 %v390_v41, %v303_v57  ;;  %v215_v62 = vadd.f32 %v213_v12, %v124_v55  ;;  %v391_v28 = vadd.f32 %v389_v15, %v387_v59 }
  0x46   :  { %395 = vst [vmem:[#allocation7 + $0x8] sm:$0xf] %v385_v32 }
  0x47   :  { %396 = vst [vmem:[#allocation7 + $0x4] sm:$0xf] %v392_v38  ;;  %v304_v23 = vadd.f32 %v302_v60, %v215_v62 }
  0x49   :  { %v393_v61 = vadd.f32 %v391_v28, %v304_v23 }
  0x4b   :  { %397 = vst [vmem:[#allocation7 + $0xc] sm:$0xf] %v393_v61 }
  0x4c   :  { %487 = shalt.err (!%p484_p6)
}
  0x4d   :  { %s488_s12 = scalar_lea.hbm %s663_s2, 256 }
  0x4e   :  { %p489_p7 = scmp.ne.s32.totalorder %s663_s2, %s488_s12  ;;  %p492_p8 = scmp.lt.u32.totalorder %s488_s12, %s663_s2 }
  0x50   :  { %p494_p9 = pnand %p492_p8, %p489_p7 }
  0x52   :  { %497 = shalt.err (!%p494_p9)
}
  0x53   :  { %409 = dma.vmem_to_hbm [thread:$0]  %s404_s8, 256, %s663_s2, [#allocation4], %s508_s0, %s508_s0, %s509_s5  }
  0x54   :  { %502 = dma.done.wait [#allocation4], 256  }
  0x55   :  { %503 = vsyncadd [#allocation4], 4294967040 }
  0x56   :  { %413 = vsyncpa [#allocation3], 1 }
  0x57   :  { %414 = vsyncpa [#allocation6], 1 }
  0x58   :  { %415 = vsyncpa [#allocation4], 1 }

</bundles_post_ra>
